<compile_context>
chip_gen: v5e
topology: v5e:2x2
jax: 0.10.0
libtpu: 0.0.40
codegen_flags: <defaults>
</compile_context>

<pallas_src>
import math

import jax
import jax.numpy as jnp
from jax.experimental import pallas as pl
from jax.experimental.pallas import tpu as pltpu


def _round_up(x, m):
    return ((x + m - 1) // m) * m


def _gelu_exact_f32(w):
    # Exact (erf-based) GELU, matching torch.nn.GELU() default.
    return 0.5 * w * (1.0 + jax.lax.erf(w * (1.0 / math.sqrt(2.0))))


# ----------------- Pass 1: weight activation (elementwise, run once) -----------------
def _weight_act_kernel(wt_ref, o_ref):
    w = wt_ref[...].astype(jnp.float32)              # GELU in f32 for accuracy
    o_ref[...] = _gelu_exact_f32(w).astype(o_ref.dtype)


# ----------------- Pass 2: tiled matmul with f32 accumulator -----------------
def _matmul_kernel(x_ref, w_ref, o_ref, acc_ref):
    @pl.when(pl.program_id(2) == 0)
    def _():
        acc_ref[...] = jnp.zeros_like(acc_ref)

    acc_ref[...] += jnp.dot(x_ref[...], w_ref[...],
                            preferred_element_type=jnp.float32)

    @pl.when(pl.program_id(2) == pl.num_programs(2) - 1)
    def _():
        o_ref[...] = acc_ref[...].astype(o_ref.dtype)


def custom_linear(x, weight, *, tm=256, tn=256, tk=512):
    """x: (B, size_in), weight: (size_out, size_in) -> (B, size_out).

    The matmul runs on the MXU in x.dtype (pass bf16 x for the fast path);
    the GELU on the weights and the accumulation are always f32.
    """
    B, K = x.shape
    N, K2 = weight.shape
    assert K == K2, "size_in mismatch"
    out_dtype = x.dtype

    # Clamp tiles to the (aligned) problem size; keep (8, 128) alignment.
    tm = min(tm, _round_up(B, 8))
    tn = min(tn, _round_up(N, 128))
    tk = min(tk, _round_up(K, 128))
    Bp, Np, Kp = _round_up(B, tm), _round_up(N, tn), _round_up(K, tk)

    # Wrapper-side layout plumbing: transpose W to (K, N) for canonical MXU
    # layout / lane-dense output stores; zero-pad to tile multiples.
    xp = jnp.pad(x, ((0, Bp - B), (0, Kp - K))) if (Bp, Kp) != (B, K) else x
    wt = weight.T
    if (Kp, Np) != (K, N):
        wt = jnp.pad(wt, ((0, Kp - K), (0, Np - N)))

    itemsize_w = jnp.dtype(weight.dtype).itemsize
    itemsize_x = jnp.dtype(out_dtype).itemsize

    # Pass 1: W_act^T = gelu(W)^T — once, amortized across all batch tiles.
    w_act_t = pl.pallas_call(
        _weight_act_kernel,
        out_shape=jax.ShapeDtypeStruct((Kp, Np), out_dtype),
        grid=(Kp // tk, Np // tn),
        in_specs=[pl.BlockSpec((tk, tn), lambda i, j: (i, j))],
        out_specs=pl.BlockSpec((tk, tn), lambda i, j: (i, j)),
        compiler_params=pltpu.CompilerParams(
            dimension_semantics=("parallel", "parallel")),
        cost_estimate=pl.CostEstimate(
            flops=8 * Kp * Np,
            transcendentals=Kp * Np,
            bytes_accessed=Kp * Np * (itemsize_w + itemsize_x)),
    )(wt)

    # Pass 2: tiled matmul out = x @ W_act^T with f32 accumulation.
    out_p = pl.pallas_call(
        _matmul_kernel,
        out_shape=jax.ShapeDtypeStruct((Bp, Np), out_dtype),
        grid=(Bp // tm, Np // tn, Kp // tk),
        in_specs=[
            pl.BlockSpec((tm, tk), lambda i, j, k: (i, k)),
            pl.BlockSpec((tk, tn), lambda i, j, k: (k, j)),
        ],
        out_specs=pl.BlockSpec((tm, tn), lambda i, j, k: (i, j)),
        scratch_shapes=[pltpu.VMEM((tm, tn), jnp.float32)],
        compiler_params=pltpu.CompilerParams(
            dimension_semantics=("parallel", "parallel", "arbitrary")),
        cost_estimate=pl.CostEstimate(
            flops=2 * Bp * Np * Kp,
            transcendentals=0,
            bytes_accessed=(Bp * Kp + Kp * Np + Bp * Np) * itemsize_x),
    )(xp, w_act_t)

    return out_p[:B, :N]


def init_weight(key, size_out, size_in, dtype=jnp.float32):
    # kaiming_uniform_(a=sqrt(5)): bound = sqrt(6 / ((1 + a^2) * fan_in)) = 1/sqrt(fan_in)
    bound = 1.0 / math.sqrt(size_in)
    return jax.random.uniform(key, (size_out, size_in), dtype=dtype,
                              minval=-bound, maxval=bound)


if __name__ == "__main__":
    # Small shapes consistent with the module: batch=8, size_in=32, size_out=16
    batch, size_in, size_out = 8, 32, 16

    key = jax.random.PRNGKey(0)
    kx, kw = jax.random.split(key)
    x = jax.random.normal(kx, (batch, size_in), dtype=jnp.float32)
    weight = init_weight(kw, size_out, size_in)

    # f32 path (MXU operands f32) — exact against the pure-JAX reference.
    out = jax.block_until_ready(custom_linear(x, weight))
    ref = x @ _gelu_exact_f32(weight).T
    assert out.shape == (batch, size_out)
    assert jnp.allclose(out, ref, atol=1e-5, rtol=1e-5), "f32 mismatch vs reference"

    # bf16 MXU path (GELU still f32, accumulation f32) — looser tolerance.
    out_bf16 = jax.block_until_ready(custom_linear(x.astype(jnp.bfloat16), weight))
    assert out_bf16.dtype == jnp.bfloat16
    assert jnp.allclose(out_bf16.astype(jnp.float32), ref, atol=5e-2, rtol=5e-2), \
        "bf16 mismatch vs reference"

    # TODO(synk): bias=True path not implemented — in the PyTorch module
    # `if self.bias:` on a multi-element Parameter would raise, so bias=False
    # is the only usable configuration.

    print("KERNEL_OK")
</pallas_src>

<mosaic_0001>
module attributes {stable_mosaic.version = 11 : i64} {
  func.func @_weight_act_kernel(%arg0: i32, %arg1: i32, %arg2: memref<128x128xf32, #tpu.memory_space<vmem>>, %arg3: memref<128x128xf32, #tpu.memory_space<vmem>>) attributes {dimension_semantics = [#tpu.dimension_semantics<parallel>, #tpu.dimension_semantics<parallel>], iteration_bounds = array<i64: 1, 1>, scalar_prefetch = 0 : i64, scratch_operands = 0 : i64, tpu.core_type = #tpu.core_type<tc>, window_params = [{transform_indices = @transform_0, window_bounds = array<i64: 128, 128>}, {transform_indices = @transform_1, window_bounds = array<i64: 128, 128>}]} {
    %c0 = arith.constant 0 : index
    %c0_0 = arith.constant 0 : index
    %0 = vector.load %arg2[%c0, %c0_0] : memref<128x128xf32, #tpu.memory_space<vmem>>, vector<128x128xf32>
    %cst = arith.constant 5.000000e-01 : f32
    %1 = vector.broadcast %cst : f32 to vector<128x128xf32>
    %2 = arith.mulf %1, %0 : vector<128x128xf32>
    %cst_1 = arith.constant 0.707106769 : f32
    %3 = vector.broadcast %cst_1 : f32 to vector<128x128xf32>
    %4 = arith.mulf %0, %3 : vector<128x128xf32>
    %5 = math.erf %4 : vector<128x128xf32>
    %cst_2 = arith.constant 1.000000e+00 : f32
    %6 = vector.broadcast %cst_2 : f32 to vector<128x128xf32>
    %7 = arith.addf %6, %5 : vector<128x128xf32>
    %8 = arith.mulf %2, %7 : vector<128x128xf32>
    %c0_3 = arith.constant 0 : index
    %c0_4 = arith.constant 0 : index
    %9 = vector.load %arg3[%c0_3, %c0_4] : memref<128x128xf32, #tpu.memory_space<vmem>>, vector<128x128xf32>
    tpu.vector_store %arg3[%c0_3, %c0_4], %8 {strides = array<i32>} : memref<128x128xf32, #tpu.memory_space<vmem>>, vector<128x128xf32>,
    return
  }
  func.func @transform_0(%arg0: i32, %arg1: i32) -> (i32, i32) {
    %c0_i32 = arith.constant 0 : i32
    return %arg0, %arg1 : i32, i32
  }
  func.func @transform_1(%arg0: i32, %arg1: i32) -> (i32, i32) {
    %c0_i32 = arith.constant 0 : i32
    return %arg0, %arg1 : i32, i32
  }
}

</mosaic_0001>

<bundles_post_ra>
// kernel: tpu_custom_call.1
= control target key start
LH: loop header
LB: loop body
LE: loop exit
PB: predicated region body
PF: predicated region fallthrough
CT: control target
= control target key end

     0   :  { %6 = vsyncpa [#allocation3], 0  ;;  %s1438_s0 = inlined_call_operand.hbm [shape: f32[128,128], index: 0, kind: input, shape index: {}]   ;;  %s1439_s1 = inlined_call_operand.hbm [shape: f32[128,128], index: 1, kind: output, shape index: {}]  }
   0x1   :  { %7 = vsyncpa [#allocation4], 0  ;;  %s12_s8 = sshll.u32 %s1438_s0, 4  ;;  %s884_s9 = smov [#allocation2]   ;;  %s13_s8 = int_to_ptr.hbm [resolvable:$true] %s12_s8 }
   0x2   :  { %s14_s10 = sshll.u32 %s884_s9, 4  ;;  %s885_s11 = smov 128   ;;  %s15_s10 = int_to_ptr.vmem [resolvable:$true] %s14_s10 }
   0x3   :  { %s886_s12 = smov 8  }
   0x4   :  { %20 = dma.hbm_to_vmem [thread:$0]  %s13_s8, 2048, %s15_s10, [#allocation3], %s885_s11, %s885_s11, %s886_s12  }
   0x5   :  { %880 = dma.done.wait [#allocation3], 2048  }
   0x6   :  { %881 = vsyncadd [#allocation3], 4294965248  ;;  %v904_v0 = vld [vmem:[#allocation2] sm:$0xff]  ;;  %v906_v1 = vld [vmem:[#allocation2 + $0x8] sm:$0xff]  ;;  %s887_s0 = smov [#allocation5]   ;;  %s767_s16 = sshll.u32 %s1439_s1, 4  ;;  %s768_s16 = int_to_ptr.hbm [resolvable:$true] %s767_s16 }
   0x7   :  { %v908_v2 = vld [vmem:[#allocation2 + $0x10] sm:$0xff]  ;;  %v911_v3 = vmul.f32 0.70710677, %v904_v0  ;;  %v914_v4 = vmul.f32 0.70710677, %v906_v1  ;;  %v916_v5 = vld [vmem:[#allocation2 + $0x18] sm:$0xff] }
   0x8   :  { %v919_v6 = vmul.f32 0.70710677, %v908_v2  ;;  %v922_v7 = vmul.f32 0.70710677, %v916_v5  ;;  %v956_v45 = vld [vmem:[#allocation2 + $0x20] sm:$0xff]  ;;  %v969_v61 = vld [vmem:[#allocation2 + $0x28] sm:$0xff] }
   0x9   :  { %v73_v8 = vmul.f32 %v911_v3, %v911_v3  ;;  %v113_v9 = vmul.f32 %v914_v4, %v914_v4  ;;  %v964_v56 = vmul.f32 0.70710677, %v956_v45  ;;  %s765_s13 = sshll.u32 %s887_s0, 4  ;;  %s766_s13 = int_to_ptr.vmem [resolvable:$true] %s765_s13 }
   0xa   :  { %v153_v10 = vmul.f32 %v919_v6, %v919_v6  ;;  %v193_v11 = vmul.f32 %v922_v7, %v922_v7 }
   0xb   :  { %v932_v12 = vmin.f32 %v73_v8, 16.0  ;;  %v934_v13 = vmin.f32 %v113_v9, 16.0 }
   0xc   :  { %v936_v14 = vmin.f32 %v153_v10, 16.0  ;;  %v938_v15 = vmin.f32 %v193_v11, 16.0 }
   0xd   :  { %v75_v16 = vmul.f32 2.1237322e-06, %v932_v12  ;;  %v86_v17 = vmul.f32 3.8918573e-05, %v932_v12  ;;  %v115_v18 = vmul.f32 2.1237322e-06, %v934_v13 }
   0xe   :  { %v126_v19 = vmul.f32 3.8918573e-05, %v934_v13  ;;  %v155_v20 = vmul.f32 2.1237322e-06, %v936_v14  ;;  %v166_v21 = vmul.f32 3.8918573e-05, %v936_v14 }
   0xf   :  { %v76_v22 = vadd.f32 0.00028619796, %v75_v16  ;;  %v87_v23 = vadd.f32 0.001143296, %v86_v17  ;;  %v116_v24 = vadd.f32 0.00028619796, %v115_v18 }
  0x10   :  { %v127_v25 = vadd.f32 0.001143296, %v126_v19  ;;  %v156_v26 = vadd.f32 0.00028619796, %v155_v20  ;;  %v167_v27 = vadd.f32 0.001143296, %v166_v21 }
  0x11   :  { %v77_v28 = vmul.f32 %v76_v22, %v932_v12  ;;  %v88_v29 = vmul.f32 %v87_v23, %v932_v12  ;;  %v117_v30 = vmul.f32 %v116_v24, %v934_v13  ;;  %v195_v31 = vmul.f32 2.1237322e-06, %v938_v15 }
  0x12   :  { %v128_v32 = vmul.f32 %v127_v25, %v934_v13  ;;  %v157_v33 = vmul.f32 %v156_v26, %v936_v14  ;;  %v168_v34 = vmul.f32 %v167_v27, %v936_v14  ;;  %v206_v49 = vmul.f32 3.8918573e-05, %v938_v15 }
  0x13   :  { %v78_v35 = vadd.f32 0.0036580483, %v77_v28  ;;  %v89_v36 = vadd.f32 0.014752088, %v88_v29  ;;  %v118_v37 = vadd.f32 0.0036580483, %v117_v30  ;;  %v233_v28 = vmul.f32 %v964_v56, %v964_v56 }
  0x14   :  { %v129_v38 = vadd.f32 0.014752088, %v128_v32  ;;  %v158_v39 = vadd.f32 0.0036580483, %v157_v33  ;;  %v169_v40 = vadd.f32 0.014752088, %v168_v34 }
  0x15   :  { %v79_v41 = vmul.f32 %v78_v35, %v932_v12  ;;  %v90_v42 = vmul.f32 %v89_v36, %v932_v12  ;;  %v119_v43 = vmul.f32 %v118_v37, %v934_v13  ;;  %v196_v44 = vadd.f32 0.00028619796, %v195_v31 }
  0x16   :  { %v130_v46 = vmul.f32 %v129_v38, %v934_v13  ;;  %v159_v47 = vmul.f32 %v158_v39, %v936_v14  ;;  %v170_v48 = vmul.f32 %v169_v40, %v936_v14  ;;  %v207_v9 = vadd.f32 0.001143296, %v206_v49 }
  0x17   :  { %v80_v50 = vadd.f32 0.05243302, %v79_v41  ;;  %v91_v51 = vadd.f32 0.112945676, %v90_v42  ;;  %v120_v52 = vadd.f32 0.05243302, %v119_v43  ;;  %v197_v53 = vmul.f32 %v196_v44, %v938_v15 }
  0x18   :  { %v131_v54 = vadd.f32 0.112945676, %v130_v46  ;;  %v160_v55 = vadd.f32 0.05243302, %v159_v47  ;;  %v171_v60 = vadd.f32 0.112945676, %v170_v48  ;;  %v208_v27 = vmul.f32 %v207_v9, %v938_v15 }
  0x19   :  { %v81_v57 = vmul.f32 %v80_v50, %v932_v12  ;;  %v92_v58 = vmul.f32 %v91_v51, %v932_v12  ;;  %v121_v59 = vmul.f32 %v120_v52, %v934_v13  ;;  %v198_v8 = vadd.f32 0.0036580483, %v197_v53 }
  0x1a   :  { %v132_v62 = vmul.f32 %v131_v54, %v934_v13  ;;  %v161_v63 = vmul.f32 %v160_v55, %v936_v14  ;;  %v172_v17 = vmul.f32 %v171_v60, %v936_v14  ;;  %v976_v21 = vmul.f32 0.70710677, %v969_v61 }
  0x1b   :  { %v82_v10 = vadd.f32 0.18741608, %v81_v57  ;;  %v93_v11 = vadd.f32 0.4994258, %v92_v58  ;;  %v122_v16 = vadd.f32 0.18741608, %v121_v59  ;;  %v199_v20 = vmul.f32 %v198_v8, %v938_v15 }
  0x1c   :  { %v133_v18 = vadd.f32 0.4994258, %v132_v62  ;;  %v162_v19 = vadd.f32 0.18741608, %v161_v63  ;;  %v173_v25 = vadd.f32 0.4994258, %v172_v17  ;;  %v273_v37 = vmul.f32 %v976_v21, %v976_v21 }
  0x1d   :  { %v83_v22 = vmul.f32 %v82_v10, %v932_v12  ;;  %v94_v23 = vmul.f32 %v93_v11, %v932_v12  ;;  %v123_v24 = vmul.f32 %v122_v16, %v934_v13  ;;  %v200_v32 = vadd.f32 0.05243302, %v199_v20 }
  0x1e   :  { %v134_v26 = vmul.f32 %v133_v18, %v934_v13  ;;  %v163_v31 = vmul.f32 %v162_v19, %v936_v14  ;;  %v987_v33 = vmul.f32 0.5, %v904_v0  ;;  %v174_v12 = vmul.f32 %v173_v25, %v936_v14 }
  0x1f   :  { %v84_v29 = vadd.f32 1.1283791, %v83_v22  ;;  %v95_v30 = vadd.f32 1.0, %v94_v23  ;;  %v209_v35 = vadd.f32 0.014752088, %v208_v27  ;;  %v991_v13 = vmul.f32 0.5, %v906_v1 }
  0x20   :  { %v135_v34 = vadd.f32 1.0, %v134_v26  ;;  %v124_v36 = vadd.f32 1.1283791, %v123_v24  ;;  %v995_v40 = vmin.f32 %v233_v28, 16.0  ;;  %v1001_v41 = vmul.f32 0.5, %v908_v2 }
  0x21   :  { %800 = vrcp.f32 %v95_v30  ;;  %v105_v38 = vand.u32 2147483647, %v95_v30  ;;  %v107_v39 = vand.u32 2147483648, %v95_v30  ;;  %v998_v0 = vmul.f32 %v84_v29, %v911_v3 }
  0x22   :  { %802 = vrcp.f32 %v135_v34  ;;  %v164_v14 = vadd.f32 1.1283791, %v163_v31  ;;  %v201_v42 = vmul.f32 %v200_v32, %v938_v15  ;;  %v145_v1 = vand.u32 2147483647, %v135_v34 }
  0x23   :  { %v147_v43 = vand.u32 2147483648, %v135_v34  ;;  %v1004_v44 = vadd.f32 1.0, %v174_v12  ;;  %v210_v46 = vmul.f32 %v209_v35, %v938_v15  ;;  %vm101_vm0 = vweird.f32 %v95_v30 }
  0x24   :  { %v125_v47 = vmul.f32 %v124_v36, %v914_v4  ;;  %vm141_vm1 = vweird.f32 %v135_v34  ;;  %v235_v48 = vmul.f32 2.1237322e-06, %v995_v40  ;;  %vm1009_vm2 = vcmp.eq.f32.partialorder %v105_v38, 8.507059e+37 }
  0x25   :  { %v108_v2 = vor.u32 1.1754944e-38, %v107_v39  ;;  %804 = vrcp.f32 %v1004_v44  ;;  %v246_v49 = vmul.f32 3.8918573e-05, %v995_v40  ;;  %v1016_v51 = vmul.f32 %v164_v14, %v919_v6 }
  0x26   :  { %v202_v52 = vadd.f32 0.18741608, %v201_v42  ;;  %v211_v53 = vadd.f32 0.112945676, %v210_v46  ;;  %v236_v54 = vadd.f32 0.00028619796, %v235_v48  ;;  %vm181_vm4 = vweird.f32 %v1004_v44 }
  0x27   :  { %v801_v50 = vpop.eup %800  ;;  %vm1018_vm3 = vcmp.eq.f32.partialorder %v145_v1, 8.507059e+37  ;;  %v148_v58 = vor.u32 1.1754944e-38, %v147_v43  ;;  %v185_v60 = vand.u32 2147483647, %v1004_v44  ;;  %v247_v8 = vadd.f32 0.001143296, %v246_v49 }
  0x28   :  { %v803_v4 = vpop.eup %802  ;;  %v97_v55 = vmul.f32 %v801_v50, %v95_v30  ;;  %vm102_vm5 = vweird.f32 %v801_v50  ;;  %v212_v62 = vmul.f32 %v211_v53, %v938_v15  ;;  %v237_v63 = vmul.f32 %v236_v54, %v995_v40  ;;  %v1060_v1 = vld [vmem:[#allocation2 + $0x30] sm:$0xff] }
  0x29   :  { %v137_v59 = vmul.f32 %v803_v4, %v135_v34  ;;  %v1026_v9 = vmin.f32 %v273_v37, 16.0  ;;  %vm142_vm6 = vweird.f32 %v803_v4  ;;  %v187_v11 = vand.u32 2147483648, %v1004_v44  ;;  %vm1033_vm7 = vmor %vm101_vm0, %vm102_vm5 }
  0x2a   :  { %v98_v6 = vsub.f32 1.0, %v97_v55  ;;  %v213_v16 = vadd.f32 0.4994258, %v212_v62  ;;  %v238_v19 = vadd.f32 0.0036580483, %v237_v63  ;;  %v248_v20 = vmul.f32 %v247_v8, %v995_v40  ;;  %vm1041_vm8 = vmor %vm141_vm1, %vm142_vm6 }
  0x2b   :  { %v138_v10 = vsub.f32 1.0, %v137_v59  ;;  %v805_v17 = vpop.eup %804  ;;  %v275_v22 = vmul.f32 2.1237322e-06, %v1026_v9  ;;  %v203_v26 = vmul.f32 %v202_v52, %v938_v15  ;;  %vm1050_vm10 = vcmp.eq.f32.partialorder %v185_v60, 8.507059e+37 }
  0x2c   :  { %v99_v18 = vmul.f32 %v801_v50, %v98_v6  ;;  %v177_v25 = vmul.f32 %v805_v17, %v1004_v44  ;;  %v214_v27 = vmul.f32 %v213_v16, %v938_v15  ;;  %v239_v31 = vmul.f32 %v238_v19, %v995_v40 }
  0x2d   :  { %v139_v24 = vmul.f32 %v803_v4, %v138_v10  ;;  %v249_v30 = vadd.f32 0.014752088, %v248_v20  ;;  %v276_v32 = vadd.f32 0.00028619796, %v275_v22  ;;  %vm182_vm9 = vweird.f32 %v805_v17  ;;  %v1088_v20 = vld [vmem:[#allocation2 + $0x38] sm:$0xff] }
  0x2e   :  { %v100_v28 = vadd.f32 %v801_v50, %v99_v18  ;;  %v178_v35 = vsub.f32 1.0, %v177_v25  ;;  %v1046_v36 = vadd.f32 1.0, %v214_v27  ;;  %v240_v34 = vadd.f32 0.05243302, %v239_v31  ;;  %vm1067_vm11 = vmor %vm181_vm4, %vm182_vm9 }
  0x2f   :  { %v140_v12 = vadd.f32 %v803_v4, %v139_v24  ;;  %v250_v38 = vmul.f32 %v249_v30, %v995_v40  ;;  %v188_v3 = vor.u32 1.1754944e-38, %v187_v11  ;;  %v204_v52 = vadd.f32 1.1283791, %v203_v26 }
  0x30   :  { %v104_v37 = vsel %vm1033_vm7, %v801_v50, %v100_v28  ;;  %v179_v42 = vmul.f32 %v805_v17, %v178_v35  ;;  %806 = vrcp.f32 %v1046_v36  ;;  %v286_v53 = vmul.f32 3.8918573e-05, %v1026_v9 }
  0x31   :  { %v109_v39 = vsel %vm1009_vm2, %v108_v2, %v104_v37  ;;  %v144_v14 = vsel %vm1041_vm8, %v803_v4, %v140_v12  ;;  %v277_v2 = vmul.f32 %v276_v32, %v1026_v9  ;;  %v251_v4 = vadd.f32 0.112945676, %v250_v38  ;;  %v1104_v12 = vld [vmem:[#allocation2 + $0x40] sm:$0xff] }
  0x32   :  { %v110_v43 = vmul.f32 %v109_v39, %v998_v0  ;;  %v149_v46 = vsel %vm1018_vm3, %v148_v58, %v144_v14  ;;  %v180_v50 = vadd.f32 %v805_v17, %v179_v42  ;;  %v241_v0 = vmul.f32 %v240_v34, %v995_v40 }
  0x33   :  { %v150_v49 = vmul.f32 %v149_v46, %v125_v47  ;;  %v1075_v55 = vmul.f32 0.70710677, %v1060_v1  ;;  %vm221_vm12 = vweird.f32 %v1046_v36  ;;  %v225_v58 = vand.u32 2147483647, %v1046_v36 }
  0x34   :  { %v780_v54 = vclamps-f32 %v110_v43, 1.0  ;;  %v184_v57 = vsel %vm1067_vm11, %v805_v17, %v180_v50  ;;  %v252_v60 = vmul.f32 %v251_v4, %v995_v40  ;;  %v278_v62 = vadd.f32 0.0036580483, %v277_v2 }
  0x35   :  { %v781_v44 = vclamps-f32 %v150_v49, 1.0  ;;  %v189_v59 = vsel %vm1050_vm10, %v188_v3, %v184_v57  ;;  %v227_v10 = vand.u32 2147483648, %v1046_v36  ;;  %v287_v11 = vadd.f32 0.001143296, %v286_v53 }
  0x36   :  { %v713_v47 = vadd.f32 1.0, %v780_v54  ;;  %v807_v6 = vpop.eup %806  ;;  %v190_v8 = vmul.f32 %v189_v59, %v1016_v51  ;;  %v242_v18 = vadd.f32 0.18741608, %v241_v0  ;;  %v253_v19 = vadd.f32 0.4994258, %v252_v60 }
  0x37   :  { %v714_v63 = vadd.f32 1.0, %v781_v44  ;;  %v217_v17 = vmul.f32 %v807_v6, %v1046_v36  ;;  %vm222_vm13 = vweird.f32 %v807_v6  ;;  %v279_v24 = vmul.f32 %v278_v62, %v1026_v9 }
  0x38   :  { %v729_v16 = vmul.f32 %v713_v47, %v987_v33  ;;  %v782_v23 = vclamps-f32 %v190_v8, 1.0  ;;  %v254_v51 = vmul.f32 %v253_v19, %v995_v40  ;;  %v288_v26 = vmul.f32 %v287_v11, %v1026_v9  ;;  %vm1110_vm14 = vmor %vm221_vm12, %vm222_vm13 }
  0x39   :  { %v730_v22 = vmul.f32 %v714_v63, %v991_v13  ;;  %v218_v25 = vsub.f32 1.0, %v217_v17  ;;  %v313_v33 = vmul.f32 %v1075_v55, %v1075_v55  ;;  %v205_v28 = vmul.f32 %v204_v52, %v922_v7 }
  0x3a   :  { %745 = vst [vmem:[#allocation5] sm:$0xff] %v729_v16  ;;  %v715_v27 = vadd.f32 1.0, %v782_v23  ;;  %v1098_v29 = vmul.f32 0.70710677, %v1088_v20  ;;  %v1100_v31 = vadd.f32 1.0, %v254_v51  ;;  %v228_v7 = vor.u32 1.1754944e-38, %v227_v10 }
  0x3b   :  { %746 = vst [vmem:[#allocation5 + $0x8] sm:$0xff] %v730_v22  ;;  %v219_v13 = vmul.f32 %v807_v6, %v218_v25  ;;  %v289_v30 = vadd.f32 0.014752088, %v288_v26  ;;  %v1102_v32 = vmin.f32 %v313_v33, 16.0  ;;  %v243_v15 = vmul.f32 %v242_v18, %v995_v40 }
  0x3c   :  { %v731_v35 = vmul.f32 %v715_v27, %v1001_v41  ;;  %v280_v34 = vadd.f32 0.05243302, %v279_v24  ;;  %vm226_vm15 = vcmp.eq.f32.partialorder %v225_v58, 8.507059e+37  ;;  %808 = vrcp.f32 %v1100_v31  ;;  %v1148_v27 = vld [vmem:[#allocation2 + $0x48] sm:$0xff] }
  0x3d   :  { %v220_v38 = vadd.f32 %v807_v6, %v219_v13  ;;  %v353_v39 = vmul.f32 %v1098_v29, %v1098_v29  ;;  %v290_v41 = vmul.f32 %v289_v30, %v1026_v9  ;;  %v315_v36 = vmul.f32 2.1237322e-06, %v1102_v32 }
  0x3e   :  { %747 = vst [vmem:[#allocation5 + $0x10] sm:$0xff] %v731_v35  ;;  %v1121_v14 = vmul.f32 0.70710677, %v1104_v12  ;;  %v44_v42 = vmul.f32 0.5, %v916_v5  ;;  %v326_v43 = vmul.f32 3.8918573e-05, %v1102_v32  ;;  %v281_v3 = vmul.f32 %v280_v34, %v1026_v9 }
  0x3f   :  { %v224_v40 = vsel %vm1110_vm14, %v807_v6, %v220_v38  ;;  %v244_v48 = vadd.f32 1.1283791, %v243_v15  ;;  %v291_v2 = vadd.f32 0.112945676, %v290_v41  ;;  %v316_v50 = vadd.f32 0.00028619796, %v315_v36 }
  0x40   :  { %v229_v46 = vsel %vm226_vm15, %v228_v7, %v224_v40  ;;  %v327_v52 = vadd.f32 0.001143296, %v326_v43  ;;  %v1128_v53 = vmin.f32 %v353_v39, 16.0  ;;  %vm261_vm0 = vweird.f32 %v1100_v31 }
  0x41   :  { %v230_v49 = vmul.f32 %v229_v46, %v205_v28  ;;  %v265_v54 = vand.u32 2147483647, %v1100_v31  ;;  %v292_v5 = vmul.f32 %v291_v2, %v1026_v9  ;;  %v393_v0 = vmul.f32 %v1121_v14, %v1121_v14 }
  0x42   :  { %v809_v4 = vpop.eup %808  ;;  %v317_v57 = vmul.f32 %v316_v50, %v1102_v32  ;;  %v328_v58 = vmul.f32 %v327_v52, %v1102_v32  ;;  %v355_v47 = vmul.f32 2.1237322e-06, %v1128_v53  ;;  %v267_v60 = vand.u32 2147483648, %v1100_v31 }
  0x43   :  { %v783_v44 = vclamps-f32 %v230_v49, 1.0  ;;  %v257_v59 = vmul.f32 %v809_v4, %v1100_v31  ;;  %v282_v62 = vadd.f32 0.18741608, %v281_v3  ;;  %v293_v6 = vadd.f32 0.4994258, %v292_v5 }
  0x44   :  { %vm262_vm1 = vweird.f32 %v809_v4  ;;  %v318_v8 = vadd.f32 0.0036580483, %v317_v57  ;;  %v329_v10 = vadd.f32 0.014752088, %v328_v58  ;;  %v356_v17 = vadd.f32 0.00028619796, %v355_v47 }
  0x45   :  { %v716_v63 = vadd.f32 1.0, %v783_v44  ;;  %v258_v11 = vsub.f32 1.0, %v257_v59  ;;  %v294_v16 = vmul.f32 %v293_v6, %v1026_v9  ;;  %v1141_v18 = vmin.f32 %v393_v0, 16.0  ;;  %vm1154_vm2 = vmor %vm261_vm0, %vm262_vm1 }
  0x46   :  { %v319_v22 = vmul.f32 %v318_v8, %v1102_v32  ;;  %v330_v23 = vmul.f32 %v329_v10, %v1102_v32  ;;  %v366_v24 = vmul.f32 3.8918573e-05, %v1128_v53  ;;  %v357_v26 = vmul.f32 %v356_v17, %v1128_v53 }
  0x47   :  { %v732_v19 = vmul.f32 %v716_v63, %v44_v42  ;;  %v259_v25 = vmul.f32 %v809_v4, %v258_v11  ;;  %v295_v51 = vadd.f32 1.0, %v294_v16  ;;  %v395_v33 = vmul.f32 2.1237322e-06, %v1141_v18 }
  0x48   :  { %v245_v28 = vmul.f32 %v244_v48, %v964_v56  ;;  %v268_v30 = vor.u32 1.1754944e-38, %v267_v60  ;;  %v320_v35 = vadd.f32 0.05243302, %v319_v22  ;;  %v331_v37 = vadd.f32 0.112945676, %v330_v23 }
  0x49   :  { %748 = vst [vmem:[#allocation5 + $0x18] sm:$0xff] %v732_v19  ;;  %v260_v7 = vadd.f32 %v809_v4, %v259_v25  ;;  %vm266_vm3 = vcmp.eq.f32.partialorder %v265_v54, 8.507059e+37  ;;  %v283_v15 = vmul.f32 %v282_v62, %v1026_v9  ;;  %810 = vrcp.f32 %v295_v51 }
  0x4a   :  { %v321_v34 = vmul.f32 %v320_v35, %v1102_v32  ;;  %v332_v38 = vmul.f32 %v331_v37, %v1102_v32  ;;  %v358_v56 = vadd.f32 0.0036580483, %v357_v26  ;;  %v1162_v39 = vmul.f32 0.70710677, %v1148_v27  ;;  %v1194_v26 = vld [vmem:[#allocation2 + $0x50] sm:$0xff] }
  0x4b   :  { %v264_v31 = vsel %vm1154_vm2, %v809_v4, %v260_v7  ;;  %v367_v41 = vadd.f32 0.001143296, %v366_v24  ;;  %v396_v36 = vadd.f32 0.00028619796, %v395_v33  ;;  %v45_v42 = vmul.f32 0.5, %v956_v45 }
  0x4c   :  { %v269_v40 = vsel %vm266_vm3, %v268_v30, %v264_v31  ;;  %v333_v43 = vadd.f32 0.4994258, %v332_v38  ;;  %v359_v9 = vmul.f32 %v358_v56, %v1128_v53  ;;  %v284_v2 = vadd.f32 1.1283791, %v283_v15 }
  0x4d   :  { %v270_v46 = vmul.f32 %v269_v40, %v245_v28  ;;  %v368_v48 = vmul.f32 %v367_v41, %v1128_v53  ;;  %v397_v3 = vmul.f32 %v396_v36, %v1141_v18  ;;  %v322_v49 = vadd.f32 0.18741608, %v321_v34 }
  0x4e   :  { %v334_v50 = vmul.f32 %v333_v43, %v1102_v32  ;;  %v433_v52 = vmul.f32 %v1162_v39, %v1162_v39  ;;  %vm301_vm4 = vweird.f32 %v295_v51  ;;  %v305_v45 = vand.u32 2147483647, %v295_v51 }
  0x4f   :  { %v811_v54 = vpop.eup %810  ;;  %v784_v5 = vclamps-f32 %v270_v46, 1.0  ;;  %v369_v0 = vadd.f32 0.014752088, %v368_v48  ;;  %v307_v44 = vand.u32 2147483648, %v295_v51  ;;  %v406_v58 = vmul.f32 3.8918573e-05, %v1141_v18 }
  0x50   :  { %v297_v4 = vmul.f32 %v811_v54, %v295_v51  ;;  %v1173_v57 = vadd.f32 1.0, %v334_v50  ;;  %v360_v59 = vadd.f32 0.05243302, %v359_v9  ;;  %v398_v62 = vadd.f32 0.0036580483, %v397_v3 }
  0x51   :  { %v717_v47 = vadd.f32 1.0, %v784_v5  ;;  %v370_v60 = vmul.f32 %v369_v0, %v1128_v53  ;;  %vm302_vm5 = vweird.f32 %v811_v54  ;;  %v323_v63 = vmul.f32 %v322_v49, %v1102_v32 }
  0x52   :  { %v298_v6 = vsub.f32 1.0, %v297_v4  ;;  %812 = vrcp.f32 %v1173_v57  ;;  %v46_v10 = vmul.f32 0.5, %v969_v61  ;;  %v1180_v11 = vmin.f32 %v433_v52, 16.0  ;;  %vm1188_vm7 = vmor %vm301_vm4, %vm302_vm5 }
  0x53   :  { %v733_v8 = vmul.f32 %v717_v47, %v45_v42  ;;  %v285_v16 = vmul.f32 %v284_v2, %v976_v21  ;;  %vm1183_vm6 = vcmp.eq.f32.partialorder %v305_v45, 8.507059e+37  ;;  %v371_v22 = vadd.f32 0.112945676, %v370_v60 }
  0x54   :  { %v299_v17 = vmul.f32 %v811_v54, %v298_v6  ;;  %v308_v32 = vor.u32 1.1754944e-38, %v307_v44  ;;  %v361_v24 = vmul.f32 %v360_v59, %v1128_v53  ;;  %v399_v61 = vmul.f32 %v398_v62, %v1141_v18 }
  0x55   :  { %749 = vst [vmem:[#allocation5 + $0x20] sm:$0xff] %v733_v8  ;;  %v407_v25 = vadd.f32 0.001143296, %v406_v58  ;;  %v324_v33 = vadd.f32 1.1283791, %v323_v63  ;;  %v372_v28 = vmul.f32 %v371_v22, %v1128_v53  ;;  %vm341_vm8 = vweird.f32 %v1173_v57  ;;  %v1233_v22 = vld [vmem:[#allocation2 + $0x58] sm:$0xff] }
  0x56   :  { %v300_v21 = vadd.f32 %v811_v54, %v299_v17  ;;  %v435_v13 = vmul.f32 2.1237322e-06, %v1180_v11  ;;  %v345_v51 = vand.u32 2147483647, %v1173_v57  ;;  %v446_v35 = vmul.f32 3.8918573e-05, %v1180_v11 }
  0x57   :  { %v408_v30 = vmul.f32 %v407_v25, %v1141_v18  ;;  %v373_v15 = vadd.f32 0.4994258, %v372_v28  ;;  %v1205_v38 = vmul.f32 0.70710677, %v1194_v26  ;;  %v362_v41 = vadd.f32 0.18741608, %v361_v24 }
  0x58   :  { %v813_v37 = vpop.eup %812  ;;  %v304_v7 = vsel %vm1188_vm7, %v811_v54, %v300_v21  ;;  %v436_v34 = vadd.f32 0.00028619796, %v435_v13  ;;  %v400_v36 = vadd.f32 0.05243302, %v399_v61  ;;  %v347_v40 = vand.u32 2147483648, %v1173_v57 }
  0x59   :  { %v309_v56 = vsel %vm1183_vm6, %v308_v32, %v304_v7  ;;  %v337_v31 = vmul.f32 %v813_v37, %v1173_v57  ;;  %v374_v43 = vmul.f32 %v373_v15, %v1128_v53  ;;  %v409_v46 = vadd.f32 0.014752088, %v408_v30 }
  0x5a   :  { %v310_v42 = vmul.f32 %v309_v56, %v285_v16  ;;  %vm342_vm9 = vweird.f32 %v813_v37  ;;  %v437_v48 = vmul.f32 %v436_v34, %v1180_v11  ;;  %v447_v3 = vadd.f32 0.001143296, %v446_v35 }
  0x5b   :  { %v338_v9 = vsub.f32 1.0, %v337_v31  ;;  %v375_v49 = vadd.f32 1.0, %v374_v43  ;;  %v410_v50 = vmul.f32 %v409_v46, %v1141_v18  ;;  %v473_v52 = vmul.f32 %v1205_v38, %v1205_v38  ;;  %vm1220_vm10 = vmor %vm341_vm8, %vm342_vm9 }
  0x5c   :  { %v785_v2 = vclamps-f32 %v310_v42, 1.0  ;;  %v363_v5 = vmul.f32 %v362_v41, %v1128_v53  ;;  %v401_v45 = vmul.f32 %v400_v36, %v1141_v18  ;;  %v438_v0 = vadd.f32 0.0036580483, %v437_v48 }
  0x5d   :  { %v339_v54 = vmul.f32 %v813_v37, %v338_v9  ;;  %v348_v58 = vor.u32 1.1754944e-38, %v347_v40  ;;  %814 = vrcp.f32 %v375_v49  ;;  %v448_v47 = vmul.f32 %v447_v3, %v1180_v11  ;;  %v1253_v3 = vld [vmem:[#allocation2 + $0x60] sm:$0xff] }
  0x5e   :  { %v718_v4 = vadd.f32 1.0, %v785_v2  ;;  %v325_v59 = vmul.f32 %v324_v33, %v1075_v55  ;;  %vm346_vm11 = vcmp.eq.f32.partialorder %v345_v51, 8.507059e+37  ;;  %v411_v62 = vadd.f32 0.112945676, %v410_v50 }
  0x5f   :  { %v340_v60 = vadd.f32 %v813_v37, %v339_v54  ;;  %v47_v6 = vmul.f32 0.5, %v1060_v1  ;;  %v439_v63 = vmul.f32 %v438_v0, %v1180_v11  ;;  %v1228_v8 = vmin.f32 %v473_v52, 16.0 }
  0x60   :  { %v734_v53 = vmul.f32 %v718_v4, %v46_v10  ;;  %v364_v16 = vadd.f32 1.1283791, %v363_v5  ;;  %v402_v17 = vadd.f32 0.18741608, %v401_v45  ;;  %v412_v19 = vmul.f32 %v411_v62, %v1141_v18 }
  0x61   :  { %v344_v57 = vsel %vm1220_vm10, %v813_v37, %v340_v60  ;;  %v1236_v23 = vmul.f32 0.5, %v1088_v20  ;;  %v440_v10 = vadd.f32 0.05243302, %v439_v63  ;;  %v449_v1 = vadd.f32 0.014752088, %v448_v47 }
  0x62   :  { %750 = vst [vmem:[#allocation5 + $0x28] sm:$0xff] %v734_v53  ;;  %v349_v55 = vsel %vm346_vm11, %v348_v58, %v344_v57  ;;  %vm381_vm12 = vweird.f32 %v375_v49  ;;  %v413_v24 = vadd.f32 0.4994258, %v412_v19  ;;  %v475_v61 = vmul.f32 2.1237322e-06, %v1228_v8 }
  0x63   :  { %v350_v32 = vmul.f32 %v349_v55, %v325_v59  ;;  %v815_v25 = vpop.eup %814  ;;  %v385_v21 = vand.u32 2147483647, %v375_v49  ;;  %v450_v33 = vmul.f32 %v449_v1, %v1180_v11  ;;  %v486_v28 = vmul.f32 3.8918573e-05, %v1228_v8 }
  0x64   :  { %v1242_v13 = vmul.f32 0.70710677, %v1233_v22  ;;  %v377_v30 = vmul.f32 %v815_v25, %v375_v49  ;;  %v387_v20 = vand.u32 2147483648, %v375_v49  ;;  %v414_v35 = vmul.f32 %v413_v24, %v1141_v18 }
  0x65   :  { %v786_v51 = vclamps-f32 %v350_v32, 1.0  ;;  %vm382_vm13 = vweird.f32 %v815_v25  ;;  %v441_v37 = vmul.f32 %v440_v10, %v1180_v11  ;;  %v451_v7 = vadd.f32 0.112945676, %v450_v33 }
  0x66   :  { %v513_v15 = vmul.f32 %v1242_v13, %v1242_v13  ;;  %v378_v56 = vsub.f32 1.0, %v377_v30  ;;  %v415_v31 = vadd.f32 1.0, %v414_v35  ;;  %v476_v41 = vadd.f32 0.00028619796, %v475_v61  ;;  %vm1257_vm14 = vmor %vm381_vm12, %vm382_vm13 }
  0x67   :  { %v719_v34 = vadd.f32 1.0, %v786_v51  ;;  %v365_v36 = vmul.f32 %v364_v16, %v1098_v29  ;;  %v403_v42 = vmul.f32 %v402_v17, %v1141_v18  ;;  %v452_v40 = vmul.f32 %v451_v7, %v1180_v11 }
  0x68   :  { %v487_v43 = vadd.f32 0.001143296, %v486_v28  ;;  %v379_v9 = vmul.f32 %v815_v25, %v378_v56  ;;  %816 = vrcp.f32 %v415_v31  ;;  %v1251_v48 = vmin.f32 %v513_v15, 16.0 }
  0x69   :  { %v735_v46 = vmul.f32 %v719_v34, %v47_v6  ;;  %vm1261_vm15 = vcmp.eq.f32.partialorder %v385_v21, 8.507059e+37  ;;  %v388_v18 = vor.u32 1.1754944e-38, %v387_v20  ;;  %v442_v50 = vadd.f32 0.18741608, %v441_v37 }
  0x6a   :  { %v477_v52 = vmul.f32 %v476_v41, %v1228_v8  ;;  %v380_v54 = vadd.f32 %v815_v25, %v379_v9  ;;  %v453_v5 = vadd.f32 0.4994258, %v452_v40  ;;  %v488_v45 = vmul.f32 %v487_v43, %v1228_v8 }
  0x6b   :  { %751 = vst [vmem:[#allocation5 + $0x30] sm:$0xff] %v735_v46  ;;  %v515_v0 = vmul.f32 2.1237322e-06, %v1251_v48  ;;  %v404_v49 = vadd.f32 1.1283791, %v403_v42  ;;  %v443_v53 = vmul.f32 %v442_v50, %v1180_v11  ;;  %vm421_vm0 = vweird.f32 %v415_v31 }
  0x6c   :  { %v478_v4 = vadd.f32 0.0036580483, %v477_v52  ;;  %v1269_v44 = vmul.f32 0.70710677, %v1253_v3  ;;  %v384_v58 = vsel %vm1257_vm14, %v815_v25, %v380_v54  ;;  %v454_v47 = vmul.f32 %v453_v5, %v1180_v11 }
  0x6d   :  { %v489_v59 = vadd.f32 0.014752088, %v488_v45  ;;  %v516_v60 = vadd.f32 0.00028619796, %v515_v0  ;;  %v389_v62 = vsel %vm1261_vm15, %v388_v18, %v384_v58  ;;  %v526_v63 = vmul.f32 3.8918573e-05, %v1251_v48 }
  0x6e   :  { %v479_v6 = vmul.f32 %v478_v4, %v1228_v8  ;;  %v817_v57 = vpop.eup %816  ;;  %v390_v16 = vmul.f32 %v389_v62, %v365_v36  ;;  %v1279_v17 = vadd.f32 1.0, %v454_v47  ;;  %v425_v1 = vand.u32 2147483647, %v415_v31 }
  0x6f   :  { %v490_v19 = vmul.f32 %v489_v59, %v1228_v8  ;;  %v517_v55 = vmul.f32 %v516_v60, %v1251_v48  ;;  %v417_v10 = vmul.f32 %v817_v57, %v415_v31  ;;  %v427_v61 = vand.u32 2147483648, %v415_v31 }
  0x70   :  { %v480_v32 = vadd.f32 0.05243302, %v479_v6  ;;  %v787_v24 = vclamps-f32 %v390_v16, 1.0  ;;  %818 = vrcp.f32 %v1279_v17  ;;  %v527_v11 = vadd.f32 0.001143296, %v526_v63 }
  0x71   :  { %v418_v25 = vsub.f32 1.0, %v417_v10  ;;  %vm422_vm1 = vweird.f32 %v817_v57  ;;  %v491_v33 = vadd.f32 0.112945676, %v490_v19  ;;  %v405_v51 = vmul.f32 %v404_v49, %v1121_v14  ;;  %v1309_v49 = vld [vmem:[#allocation2 + $0x68] sm:$0xff] }
  0x72   :  { %v481_v21 = vmul.f32 %v480_v32, %v1228_v8  ;;  %v720_v28 = vadd.f32 1.0, %v787_v24  ;;  %v518_v30 = vadd.f32 0.0036580483, %v517_v55  ;;  %v444_v35 = vadd.f32 1.1283791, %v443_v53  ;;  %vm1291_vm2 = vmor %vm421_vm0, %vm422_vm1 }
  0x73   :  { %v419_v20 = vmul.f32 %v817_v57, %v418_v25  ;;  %v492_v37 = vmul.f32 %v491_v33, %v1228_v8  ;;  %v553_v7 = vmul.f32 %v1269_v44, %v1269_v44  ;;  %v428_v56 = vor.u32 1.1754944e-38, %v427_v61 }
  0x74   :  { %v736_v15 = vmul.f32 %v720_v28, %v1236_v23  ;;  %v519_v41 = vmul.f32 %v518_v30, %v1251_v48  ;;  %v528_v14 = vmul.f32 %v527_v11, %v1251_v48  ;;  %vm426_vm3 = vcmp.eq.f32.partialorder %v425_v1, 8.507059e+37  ;;  %v1332_v30 = vld [vmem:[#allocation2 + $0x70] sm:$0xff] }
  0x75   :  { %v420_v36 = vadd.f32 %v817_v57, %v419_v20  ;;  %v482_v42 = vadd.f32 0.18741608, %v481_v21  ;;  %v493_v40 = vadd.f32 0.4994258, %v492_v37  ;;  %v49_v46 = vmul.f32 0.5, %v1104_v12 }
  0x76   :  { %v819_v43 = vpop.eup %818  ;;  %752 = vst [vmem:[#allocation5 + $0x38] sm:$0xff] %v736_v15  ;;  %vm461_vm4 = vweird.f32 %v1279_v17  ;;  %v520_v23 = vadd.f32 0.05243302, %v519_v41  ;;  %v529_v31 = vadd.f32 0.014752088, %v528_v14  ;;  %v1303_v18 = vmin.f32 %v553_v7, 16.0 }
  0x77   :  { %v424_v9 = vsel %vm1291_vm2, %v817_v57, %v420_v36  ;;  %v457_v2 = vmul.f32 %v819_v43, %v1279_v17  ;;  %v465_v29 = vand.u32 2147483647, %v1279_v17  ;;  %v467_v52 = vand.u32 2147483648, %v1279_v17 }
  0x78   :  { %v429_v50 = vsel %vm426_vm3, %v428_v56, %v424_v9  ;;  %v494_v54 = vmul.f32 %v493_v40, %v1228_v8  ;;  %v530_v12 = vmul.f32 %v529_v31, %v1251_v48  ;;  %vm462_vm5 = vweird.f32 %v819_v43 }
  0x79   :  { %v430_v5 = vmul.f32 %v429_v50, %v405_v51  ;;  %v458_v45 = vsub.f32 1.0, %v457_v2  ;;  %v555_v0 = vmul.f32 2.1237322e-06, %v1303_v18  ;;  %v483_v4 = vmul.f32 %v482_v42, %v1228_v8  ;;  %vm1317_vm6 = vmor %vm461_vm4, %vm462_vm5  ;;  %v1344_v2 = vld [vmem:[#allocation2 + $0x78] sm:$0xff] }
  0x7a   :  { %v495_v58 = vadd.f32 1.0, %v494_v54  ;;  %v521_v47 = vmul.f32 %v520_v23, %v1251_v48  ;;  %v531_v59 = vadd.f32 0.112945676, %v530_v12  ;;  %v566_v6 = vmul.f32 3.8918573e-05, %v1303_v18 }
  0x7b   :  { %v788_v60 = vclamps-f32 %v430_v5, 1.0  ;;  %v459_v62 = vmul.f32 %v819_v43, %v458_v45  ;;  %v556_v53 = vadd.f32 0.00028619796, %v555_v0  ;;  %v445_v63 = vmul.f32 %v444_v35, %v1162_v39 }
  0x7c   :  { %v468_v16 = vor.u32 1.1754944e-38, %v467_v52  ;;  %820 = vrcp.f32 %v495_v58  ;;  %v1322_v8 = vmul.f32 0.70710677, %v1309_v49  ;;  %vm466_vm7 = vcmp.eq.f32.partialorder %v465_v29, 8.507059e+37 }
  0x7d   :  { %v721_v19 = vadd.f32 1.0, %v788_v60  ;;  %v460_v55 = vadd.f32 %v819_v43, %v459_v62  ;;  %v532_v10 = vmul.f32 %v531_v59, %v1251_v48  ;;  %v50_v1 = vmul.f32 0.5, %v1148_v27 }
  0x7e   :  { %v484_v32 = vadd.f32 1.1283791, %v483_v4  ;;  %v557_v39 = vmul.f32 %v556_v53, %v1303_v18  ;;  %v567_v17 = vadd.f32 0.001143296, %v566_v6  ;;  %v522_v11 = vadd.f32 0.18741608, %v521_v47 }
  0x7f   :  { %v737_v24 = vmul.f32 %v721_v19, %v49_v46  ;;  %v464_v61 = vsel %vm1317_vm6, %v819_v43, %v460_v55  ;;  %v533_v25 = vadd.f32 0.4994258, %v532_v10  ;;  %v593_v51 = vmul.f32 %v1322_v8, %v1322_v8 }
  0x80   :  { %v469_v21 = vsel %vm466_vm7, %v468_v16, %v464_v61  ;;  %v558_v33 = vadd.f32 0.0036580483, %v557_v39  ;;  %v568_v28 = vmul.f32 %v567_v17, %v1303_v18  ;;  %vm501_vm8 = vweird.f32 %v495_v58 }
  0x81   :  { %753 = vst [vmem:[#allocation5 + $0x40] sm:$0xff] %v737_v24  ;;  %v470_v27 = vmul.f32 %v469_v21, %v445_v63  ;;  %v505_v20 = vand.u32 2147483647, %v495_v58  ;;  %v534_v35 = vmul.f32 %v533_v25, %v1251_v48  ;;  %v507_v7 = vand.u32 2147483648, %v495_v58 }
  0x82   :  { %v821_v37 = vpop.eup %820  ;;  %v559_v15 = vmul.f32 %v558_v33, %v1303_v18  ;;  %v569_v34 = vadd.f32 0.014752088, %v568_v28  ;;  %v1336_v56 = vmin.f32 %v593_v51, 16.0  ;;  %v1339_v42 = vmul.f32 0.70710677, %v1332_v30 }
  0x83   :  { %v789_v41 = vclamps-f32 %v470_v27, 1.0  ;;  %v497_v14 = vmul.f32 %v821_v37, %v495_v58  ;;  %v535_v36 = vadd.f32 1.0, %v534_v35  ;;  %vm502_vm9 = vweird.f32 %v821_v37 }
  0x84   :  { %v560_v40 = vadd.f32 0.05243302, %v559_v15  ;;  %v570_v43 = vmul.f32 %v569_v34, %v1303_v18  ;;  %v595_v46 = vmul.f32 2.1237322e-06, %v1336_v56  ;;  %v606_v9 = vmul.f32 3.8918573e-05, %v1336_v56  ;;  %vm1355_vm11 = vmor %vm501_vm8, %vm502_vm9 }
  0x85   :  { %v722_v23 = vadd.f32 1.0, %v789_v41  ;;  %v498_v31 = vsub.f32 1.0, %v497_v14  ;;  %822 = vrcp.f32 %v535_v36  ;;  %v51_v29 = vmul.f32 0.5, %v1194_v26 }
  0x86   :  { %v485_v50 = vmul.f32 %v484_v32, %v1205_v38  ;;  %v523_v52 = vmul.f32 %v522_v11, %v1251_v48  ;;  %v571_v54 = vadd.f32 0.112945676, %v570_v43  ;;  %vm1349_vm10 = vcmp.eq.f32.partialorder %v505_v20, 8.507059e+37 }
  0x87   :  { %v738_v12 = vmul.f32 %v722_v23, %v50_v1  ;;  %v499_v5 = vmul.f32 %v821_v37, %v498_v31  ;;  %v596_v0 = vadd.f32 0.00028619796, %v595_v46  ;;  %v508_v47 = vor.u32 1.1754944e-38, %v507_v7 }
  0x88   :  { %v561_v26 = vmul.f32 %v560_v40, %v1303_v18  ;;  %v572_v38 = vmul.f32 %v571_v54, %v1303_v18  ;;  %v1362_v48 = vmul.f32 0.70710677, %v1344_v2  ;;  %v607_v62 = vadd.f32 0.001143296, %v606_v9 }
  0x89   :  { %754 = vst [vmem:[#allocation5 + $0x48] sm:$0xff] %v738_v12  ;;  %v500_v59 = vadd.f32 %v821_v37, %v499_v5  ;;  %v597_v60 = vmul.f32 %v596_v0, %v1336_v56  ;;  %v633_v58 = vmul.f32 %v1339_v42, %v1339_v42  ;;  %v524_v53 = vadd.f32 1.1283791, %v523_v52 }
  0x8a   :  { %vm541_vm12 = vweird.f32 %v535_v36  ;;  %v545_v6 = vand.u32 2147483647, %v535_v36  ;;  %v573_v63 = vadd.f32 0.4994258, %v572_v38  ;;  %v547_v19 = vand.u32 2147483648, %v535_v36 }
  0x8b   :  { %v823_v57 = vpop.eup %822  ;;  %v504_v16 = vsel %vm1355_vm11, %v821_v37, %v500_v59  ;;  %v608_v55 = vmul.f32 %v607_v62, %v1336_v56  ;;  %v1370_v10 = vmin.f32 %v633_v58, 16.0  ;;  %v562_v39 = vadd.f32 0.18741608, %v561_v26 }
  0x8c   :  { %v509_v1 = vsel %vm1349_vm10, %v508_v47, %v504_v16  ;;  %v537_v32 = vmul.f32 %v823_v57, %v535_v36  ;;  %v598_v17 = vadd.f32 0.0036580483, %v597_v60  ;;  %v574_v61 = vmul.f32 %v573_v63, %v1303_v18 }
  0x8d   :  { %v510_v24 = vmul.f32 %v509_v1, %v485_v50  ;;  %v609_v11 = vadd.f32 0.014752088, %v608_v55  ;;  %v673_v25 = vmul.f32 %v1362_v48, %v1362_v48  ;;  %vm542_vm13 = vweird.f32 %v823_v57 }
  0x8e   :  { %v538_v21 = vsub.f32 1.0, %v537_v32  ;;  %v635_v33 = vmul.f32 2.1237322e-06, %v1370_v10  ;;  %v646_v28 = vmul.f32 3.8918573e-05, %v1370_v10  ;;  %v525_v27 = vmul.f32 %v524_v53, %v1242_v13  ;;  %vm1387_vm15 = vmor %vm541_vm12, %vm542_vm13 }
  0x8f   :  { %v790_v51 = vclamps-f32 %v510_v24, 1.0  ;;  %v575_v20 = vadd.f32 1.0, %v574_v61  ;;  %v610_v35 = vmul.f32 %v609_v11, %v1336_v56  ;;  %vm1381_vm14 = vcmp.eq.f32.partialorder %v545_v6, 8.507059e+37 }
  0x90   :  { %v539_v37 = vmul.f32 %v823_v57, %v538_v21  ;;  %v599_v15 = vmul.f32 %v598_v17, %v1336_v56  ;;  %v636_v34 = vadd.f32 0.00028619796, %v635_v33  ;;  %v548_v40 = vor.u32 1.1754944e-38, %v547_v19 }
  0x91   :  { %v723_v41 = vadd.f32 1.0, %v790_v51  ;;  %824 = vrcp.f32 %v575_v20  ;;  %v647_v13 = vadd.f32 0.001143296, %v646_v28  ;;  %v563_v46 = vmul.f32 %v562_v39, %v1303_v18 }
  0x92   :  { %v540_v43 = vadd.f32 %v823_v57, %v539_v37  ;;  %v611_v23 = vadd.f32 0.112945676, %v610_v35  ;;  %v1392_v31 = vmin.f32 %v673_v25, 16.0  ;;  %v637_v50 = vmul.f32 %v636_v34, %v1370_v10 }
  0x93   :  { %v739_v9 = vmul.f32 %v723_v41, %v51_v29  ;;  %v600_v36 = vadd.f32 0.05243302, %v599_v15  ;;  %v52_v12 = vmul.f32 0.5, %v1233_v22  ;;  %v648_v18 = vmul.f32 %v647_v13, %v1370_v10 }
  0x94   :  { %v544_v52 = vsel %vm1387_vm15, %v823_v57, %v540_v43  ;;  %v612_v54 = vmul.f32 %v611_v23, %v1336_v56  ;;  %v675_v45 = vmul.f32 2.1237322e-06, %v1392_v31  ;;  %v564_v29 = vadd.f32 1.1283791, %v563_v46 }
  0x95   :  { %755 = vst [vmem:[#allocation5 + $0x50] sm:$0xff] %v739_v9  ;;  %v549_v5 = vsel %vm1381_vm14, %v548_v40, %v544_v52  ;;  %v686_v47 = vmul.f32 3.8918573e-05, %v1392_v31  ;;  %vm581_vm0 = vweird.f32 %v575_v20  ;;  %v638_v38 = vadd.f32 0.0036580483, %v637_v50 }
  0x96   :  { %v550_v0 = vmul.f32 %v549_v5, %v525_v27  ;;  %v613_v4 = vadd.f32 0.4994258, %v612_v54  ;;  %v649_v59 = vadd.f32 0.014752088, %v648_v18  ;;  %v676_v60 = vadd.f32 0.00028619796, %v675_v45 }
  0x97   :  { %v825_v26 = vpop.eup %824  ;;  %v585_v22 = vand.u32 2147483647, %v575_v20  ;;  %v601_v53 = vmul.f32 %v600_v36, %v1336_v56  ;;  %v587_v6 = vand.u32 2147483648, %v575_v20  ;;  %v687_v1 = vadd.f32 0.001143296, %v686_v47 }
  0x98   :  { %v791_v62 = vclamps-f32 %v550_v0, 1.0  ;;  %v577_v58 = vmul.f32 %v825_v26, %v575_v20  ;;  %vm582_vm1 = vweird.f32 %v825_v26  ;;  %v614_v63 = vmul.f32 %v613_v4, %v1336_v56 }
  0x99   :  { %v650_v57 = vmul.f32 %v649_v59, %v1370_v10  ;;  %v677_v55 = vmul.f32 %v676_v60, %v1392_v31  ;;  %v639_v39 = vmul.f32 %v638_v38, %v1370_v10  ;;  %v602_v11 = vadd.f32 0.18741608, %v601_v53  ;;  %vm583_vm2 = vmor %vm581_vm0, %vm582_vm1 }
  0x9a   :  { %v724_v16 = vadd.f32 1.0, %v791_v62  ;;  %v578_v19 = vsub.f32 1.0, %v577_v58  ;;  %v615_v32 = vadd.f32 1.0, %v614_v63  ;;  %v688_v25 = vmul.f32 %v687_v1, %v1392_v31 }
  0x9b   :  { %v651_v17 = vadd.f32 0.112945676, %v650_v57  ;;  %v565_v21 = vmul.f32 %v564_v29, %v1269_v44  ;;  %v588_v33 = vor.u32 1.1754944e-38, %v587_v6  ;;  %vm586_vm3 = vcmp.eq.f32.partialorder %v585_v22, 8.507059e+37 }
  0x9c   :  { %v740_v24 = vmul.f32 %v724_v16, %v52_v12  ;;  %v579_v61 = vmul.f32 %v825_v26, %v578_v19  ;;  %826 = vrcp.f32 %v615_v32  ;;  %v678_v27 = vadd.f32 0.0036580483, %v677_v55 }
  0x9d   :  { %v652_v51 = vmul.f32 %v651_v17, %v1370_v10  ;;  %v640_v35 = vadd.f32 0.05243302, %v639_v39  ;;  %v689_v37 = vadd.f32 0.014752088, %v688_v25  ;;  %v603_v15 = vmul.f32 %v602_v11, %v1336_v56 }
  0x9e   :  { %756 = vst [vmem:[#allocation5 + $0x58] sm:$0xff] %v740_v24  ;;  %v580_v28 = vadd.f32 %v825_v26, %v579_v61  ;;  %v679_v40 = vmul.f32 %v678_v27, %v1392_v31  ;;  %v53_v43 = vmul.f32 0.5, %v1253_v3  ;;  %vm621_vm4 = vweird.f32 %v615_v32 }
  0x9f   :  { %v653_v34 = vadd.f32 0.4994258, %v652_v51  ;;  %v690_v44 = vmul.f32 %v689_v37, %v1392_v31  ;;  %v641_v46 = vmul.f32 %v640_v35, %v1370_v10  ;;  %v604_v50 = vadd.f32 1.1283791, %v603_v15 }
  0xa0   :  { %v584_v7 = vsel %vm583_vm2, %v825_v26, %v580_v28  ;;  %v625_v56 = vand.u32 2147483647, %v615_v32  ;;  %v627_v36 = vand.u32 2147483648, %v615_v32  ;;  %v680_v45 = vadd.f32 0.05243302, %v679_v40 }
  0xa1   :  { %v589_v41 = vsel %vm586_vm3, %v588_v33, %v584_v7  ;;  %v654_v20 = vmul.f32 %v653_v34, %v1370_v10  ;;  %v691_v23 = vadd.f32 0.112945676, %v690_v44  ;;  %v642_v0 = vadd.f32 0.18741608, %v641_v46 }
  0xa2   :  { %v590_v14 = vmul.f32 %v589_v41, %v565_v21  ;;  %v827_v13 = vpop.eup %826  ;;  %v605_v47 = vmul.f32 %v604_v50, %v1322_v8  ;;  %v628_v26 = vor.u32 1.1754944e-38, %v627_v36  ;;  %vm626_vm7 = vcmp.eq.f32.partialorder %v625_v56, 8.507059e+37 }
  0xa3   :  { %v617_v52 = vmul.f32 %v827_v13, %v615_v32  ;;  %v655_v54 = vadd.f32 1.0, %v654_v20  ;;  %v692_v12 = vmul.f32 %v691_v23, %v1392_v31  ;;  %vm622_vm5 = vweird.f32 %v827_v13 }
  0xa4   :  { %v792_v9 = vclamps-f32 %v590_v14, 1.0  ;;  %vm623_vm6 = vmor %vm621_vm4, %vm622_vm5  ;;  %v681_v59 = vmul.f32 %v680_v45, %v1392_v31  ;;  %v643_v62 = vmul.f32 %v642_v0, %v1370_v10  ;;  %v54_v8 = vmul.f32 0.5, %v1309_v49 }
  0xa5   :  { %v618_v18 = vsub.f32 1.0, %v617_v52  ;;  %828 = vrcp.f32 %v655_v54  ;;  %v693_v4 = vadd.f32 0.4994258, %v692_v12  ;;  %vm661_vm8 = vweird.f32 %v655_v54 }
  0xa6   :  { %v725_v5 = vadd.f32 1.0, %v792_v9  ;;  %v682_v16 = vadd.f32 0.18741608, %v681_v59  ;;  %v644_v19 = vadd.f32 1.1283791, %v643_v62  ;;  %v667_v55 = vand.u32 2147483648, %v655_v54 }
  0xa7   :  { %v619_v3 = vmul.f32 %v827_v13, %v618_v18  ;;  %v694_v60 = vmul.f32 %v693_v4, %v1392_v31  ;;  %v665_v39 = vand.u32 2147483647, %v655_v54  ;;  %v55_v34 = vmul.f32 0.5, %v1332_v30 }
  0xa8   :  { %v741_v29 = vmul.f32 %v725_v5, %v53_v43  ;;  %v683_v10 = vmul.f32 %v682_v16, %v1392_v31  ;;  %v668_v61 = vor.u32 1.1754944e-38, %v667_v55  ;;  %v645_v21 = vmul.f32 %v644_v19, %v1339_v42 }
  0xa9   :  { %v620_v38 = vadd.f32 %v827_v13, %v619_v3  ;;  %v695_v22 = vadd.f32 1.0, %v694_v60  ;;  %vm666_vm11 = vcmp.eq.f32.partialorder %v665_v39, 8.507059e+37  ;;  %v56_v23 = vmul.f32 0.5, %v1344_v2 }
  0xaa   :  { %757 = vst [vmem:[#allocation5 + $0x60] sm:$0xff] %v741_v29  ;;  %v684_v51 = vadd.f32 1.1283791, %v683_v10 }
  0xab   :  { %v624_v58 = vsel %vm623_vm6, %v827_v13, %v620_v38  ;;  %v829_v53 = vpop.eup %828  ;;  %830 = vrcp.f32 %v695_v22  ;;  %vm701_vm12 = vweird.f32 %v695_v22  ;;  %v707_v27 = vand.u32 2147483648, %v695_v22 }
  0xac   :  { %v629_v6 = vsel %vm626_vm7, %v628_v26, %v624_v58  ;;  %v657_v57 = vmul.f32 %v829_v53, %v655_v54  ;;  %vm662_vm9 = vweird.f32 %v829_v53  ;;  %v705_v7 = vand.u32 2147483647, %v695_v22 }
  0xad   :  { %v630_v63 = vmul.f32 %v629_v6, %v605_v47  ;;  %vm663_vm10 = vmor %vm661_vm8, %vm662_vm9  ;;  %v708_v44 = vor.u32 1.1754944e-38, %v707_v27  ;;  %v685_v42 = vmul.f32 %v684_v51, %v1362_v48 }
  0xae   :  { %v658_v32 = vsub.f32 1.0, %v657_v57  ;;  %vm706_vm15 = vcmp.eq.f32.partialorder %v705_v7, 8.507059e+37 }
  0xaf   :  { %v793_v1 = vclamps-f32 %v630_v63, 1.0 }
  0xb0   :  { %v659_v24 = vmul.f32 %v829_v53, %v658_v32 }
  0xb1   :  { %v726_v17 = vadd.f32 1.0, %v793_v1  ;;  %v831_v11 = vpop.eup %830 }
  0xb2   :  { %v660_v33 = vadd.f32 %v829_v53, %v659_v24  ;;  %v697_v49 = vmul.f32 %v831_v11, %v695_v22  ;;  %vm702_vm13 = vweird.f32 %v831_v11 }
  0xb3   :  { %v742_v25 = vmul.f32 %v726_v17, %v54_v8  ;;  %vm703_vm14 = vmor %vm701_vm12, %vm702_vm13 }
  0xb4   :  { %v664_v28 = vsel %vm663_vm10, %v829_v53, %v660_v33  ;;  %v698_v37 = vsub.f32 1.0, %v697_v49 }
  0xb5   :  { %758 = vst [vmem:[#allocation5 + $0x68] sm:$0xff] %v742_v25  ;;  %v669_v35 = vsel %vm666_vm11, %v668_v61, %v664_v28 }
  0xb6   :  { %v670_v15 = vmul.f32 %v669_v35, %v645_v21  ;;  %v699_v31 = vmul.f32 %v831_v11, %v698_v37 }
  0xb8   :  { %v794_v41 = vclamps-f32 %v670_v15, 1.0  ;;  %v700_v14 = vadd.f32 %v831_v11, %v699_v31 }
  0xba   :  { %v727_v20 = vadd.f32 1.0, %v794_v41  ;;  %v704_v40 = vsel %vm703_vm14, %v831_v11, %v700_v14 }
  0xbb   :  { %v709_v43 = vsel %vm706_vm15, %v708_v44, %v704_v40 }
  0xbc   :  { %v743_v13 = vmul.f32 %v727_v20, %v55_v34  ;;  %v710_v46 = vmul.f32 %v709_v43, %v685_v42 }
  0xbe   :  { %759 = vst [vmem:[#allocation5 + $0x70] sm:$0xff] %v743_v13  ;;  %v795_v9 = vclamps-f32 %v710_v46, 1.0 }
  0xc0   :  { %v728_v30 = vadd.f32 1.0, %v795_v9 }
  0xc2   :  { %v744_v50 = vmul.f32 %v728_v30, %v56_v23 }
  0xc4   :  { %760 = vst [vmem:[#allocation5 + $0x78] sm:$0xff] %v744_v50 }
  0xc5   :  { %773 = dma.vmem_to_hbm [thread:$0]  %s766_s13, 2048, %s768_s16, [#allocation4], %s885_s11, %s885_s11, %s886_s12  }
  0xc6   :  { %882 = dma.done.wait [#allocation4], 2048  }
  0xc7   :  { %883 = vsyncadd [#allocation4], 4294965248 }
  0xc8   :  { %778 = vsyncpa [#allocation3], 1 }
  0xc9   :  { %779 = vsyncpa [#allocation4], 1 }

</bundles_post_ra>
